<compile_context>
chip_gen: v6e
topology: v6e:2x2x1
jax: 0.10.0
libtpu: 0.0.40
codegen_flags: <defaults>
</compile_context>

<pallas_src>
import jax
import jax.numpy as jnp
from jax import lax
from jax.experimental import pallas as pl
from jax.experimental.pallas import tpu as pltpu


def _attn_birnn_kernel(embed_ref, mask_ref, wih_ref, whh_ref, b_ref, v_ref,
                       enc_ref, xp_ref, out_ref):
  """Fused BiRNN + masked dot-attention pooling, fully VMEM-resident.

  Shapes (time-major inside the kernel):
    embed_ref : (T, B, E)
    mask_ref  : (T, B)      1.0 = valid, 0.0 = pad
    wih_ref   : (E, 2H)     [wih_f | wih_b]
    whh_ref   : (2H, 2H)    blockdiag(whh_f, whh_b)
    b_ref     : (1, 2H)     [b_f | b_b]   (each = b_ih + b_hh)
    v_ref     : (1, 1, 2H)  attention vector
    enc_ref   : (B, 2H)     output
    xp_ref    : (T, B, 2H)  VMEM scratch: hoisted input projection
    out_ref   : (T, B, 2H)  VMEM scratch: BiRNN output [forward | backward]
  """
  T, B, E = embed_ref.shape
  H2 = whh_ref.shape[0]
  H = H2 // 2

  # ---- (1) hoisted input projection: ONE (T*B, E) x (E, 2H) GEMM ----------
  # Removes half of the serial per-step MXU work and all per-step bias adds.
  x2d = embed_ref[...].reshape(T * B, E)
  xp = jnp.dot(x2d, wih_ref[...],
               preferred_element_type=jnp.float32) + b_ref[...]
  xp_ref[...] = xp.reshape(T, B, H2)

  # ---- (2) fused fwd/bwd recurrence: one blockdiag matmul + one tanh/step --
  whh = whh_ref[...]                                        # hoisted (2H, 2H)
  # lanes [0, H) carry the forward chain, lanes [H, 2H) the backward chain
  lane_is_fwd = lax.broadcasted_iota(jnp.int32, (B, H2), 1) < H

  h = jnp.zeros((B, H2), jnp.float32)                       # [h_fwd | h_bwd]
  for s in range(T):                                        # static T -> fully unrolled
    tf = s
    tb = T - 1 - s
    # forward drive at t = tf in lanes [0,H); backward drive at t = tb in [H,2H)
    drive = jnp.where(lane_is_fwd, xp_ref[tf], xp_ref[tb])  # (B, 2H)
    h = jnp.tanh(drive + jnp.dot(h, whh, preferred_element_type=jnp.float32))
    out_ref[tf, :, 0:H] = h[:, 0:H]                         # forward half  @ t = s
    out_ref[tb, :, H:H2] = h[:, H:H2]                       # backward half @ t = T-1-s

  # ---- (3) masked dot-product attention pooling (VPU/XLU, no N=1 matmul) ---
  out = out_ref[...]                                        # (T, B, 2H)
  valid = mask_ref[...] > 0                                 # (T, B), computed once
  scores = jnp.sum(out * v_ref[...], axis=-1)               # (T, B)  VPU mul + lane reduce
  scores = jnp.where(valid, scores, -1e30)
  m = jnp.max(scores, axis=0, keepdims=True)                # (1, B)
  e = jnp.exp(scores - m) * valid.astype(jnp.float32)       # (T, B)
  denom = jnp.maximum(jnp.sum(e, axis=0, keepdims=True), 1e-30)  # all-pad guard
  alpha = e * pl.reciprocal(denom, approx=True)             # EUP reciprocal (free slot)
  enc_ref[...] = jnp.sum(alpha[:, :, None] * out, axis=0).astype(enc_ref.dtype)


def attn_birnn_encoder(embed, lengths, mask, params):
  """Mirrors AttnBiRNNEncoder.forward(embed, lengths, mask)."""
  assert lengths is not None, "Lengths of input is needed when using RNN"
  lengths = lengths - 1  # mirrors `lengths -= 1` in the PyTorch module (unused afterwards)
  B, T, E = embed.shape
  H = params["whh_f"].shape[0]
  H2 = 2 * H

  # One-time fusion of the per-direction parameters (tiny, done by XLA outside
  # the kernel): wih = [wih_f | wih_b], b = [b_f | b_b], whh = blockdiag.
  wih = jnp.concatenate([params["wih_f"], params["wih_b"]], axis=1)      # (E, 2H)
  b = jnp.concatenate([params["b_f"], params["b_b"]], axis=1)            # (1, 2H)
  zeros_hh = jnp.zeros((H, H), jnp.float32)
  whh = jnp.concatenate(
      [jnp.concatenate([params["whh_f"], zeros_hh], axis=1),
       jnp.concatenate([zeros_hh, params["whh_b"]], axis=1)], axis=0)    # (2H, 2H)
  v = params["v"].reshape(1, 1, H2)                                      # (1, 1, 2H)

  # Time-major presentation for the kernel (cheap at these shapes). For
  # production sizes: do the projection GEMM batch-first in-kernel to drop
  # this HBM transpose pass, and add a batch-tile grid with BlockSpec
  # pipelining marked "parallel" (sized to v7x's 64 MiB VMEM).
  embed_tm = jnp.transpose(embed, (1, 0, 2)).astype(jnp.float32)         # (T, B, E)
  mask_tm = jnp.transpose(mask, (1, 0)).astype(jnp.float32)              # (T, B)

  vmem = pl.BlockSpec(memory_space=pltpu.MemorySpace.VMEM)
  encoded = pl.pallas_call(
      _attn_birnn_kernel,
      out_shape=jax.ShapeDtypeStruct((B, H2), jnp.float32),
      in_specs=[vmem] * 6,
      out_specs=vmem,
      scratch_shapes=[pltpu.VMEM((T, B, H2), jnp.float32),   # xp_ref
                      pltpu.VMEM((T, B, H2), jnp.float32)],  # out_ref
  )(embed_tm, mask_tm, wih, whh, b, v)
  return encoded


def reference_jax(embed, mask, params):
  """Pure-JAX reference with identical semantics (for verification)."""
  B, T, E = embed.shape
  H = params["whh_f"].shape[0]
  x = jnp.transpose(embed, (1, 0, 2)).astype(jnp.float32)          # (T, B, E)

  def step(wih, whh, b):
    def f(h, x_t):
      h = jnp.tanh(x_t @ wih + h @ whh + b)
      return h, h
    return f

  h0 = jnp.zeros((B, H), jnp.float32)
  _, outs_f = lax.scan(step(params["wih_f"], params["whh_f"], params["b_f"]),
                       h0, x)
  _, outs_b_rev = lax.scan(step(params["wih_b"], params["whh_b"], params["b_b"]),
                           h0, x[::-1])
  outs_b = outs_b_rev[::-1]
  out = jnp.concatenate([outs_f, outs_b], axis=-1)                 # (T, B, 2H)

  mask_tm = jnp.transpose(mask, (1, 0)).astype(jnp.float32)        # (T, B)
  scores = (out.reshape(T * B, 2 * H) @ params["v"]).reshape(T, B)
  scores = jnp.where(mask_tm > 0, scores, -1e30)
  m = jnp.max(scores, axis=0, keepdims=True)
  e = jnp.exp(scores - m) * (mask_tm > 0).astype(jnp.float32)
  alpha = e / jnp.sum(e, axis=0, keepdims=True)
  return jnp.sum(alpha[:, :, None] * out, axis=0)                  # (B, 2H)


def init_params(key, embed_dim, hidden):
  """Deterministic parameter init (shapes follow nn.RNN bidirectional)."""
  ks = jax.random.split(key, 9)
  s = 1.0 / jnp.sqrt(hidden)
  u = lambda k, shape: jax.random.uniform(k, shape, jnp.float32, -s, s)
  return {
      # forward direction (stored pre-transposed: x @ W_ih^T -> (E,H))
      "wih_f": u(ks[0], (embed_dim, hidden)),
      "whh_f": u(ks[1], (hidden, hidden)),
      "b_f":   u(ks[2], (1, hidden)) + u(ks[3], (1, hidden)),  # b_ih + b_hh
      # backward direction
      "wih_b": u(ks[4], (embed_dim, hidden)),
      "whh_b": u(ks[5], (hidden, hidden)),
      "b_b":   u(ks[6], (1, hidden)) + u(ks[7], (1, hidden)),
      # attention vector over the 2H bidirectional features
      "v":     u(ks[8], (2 * hidden, 1)),
  }


if __name__ == "__main__":
  B, T, E, H = 2, 8, 16, 32

  key = jax.random.PRNGKey(0)
  k_emb, k_par = jax.random.split(key)
  embed = jax.random.normal(k_emb, (B, T, E), jnp.float32)
  lengths = jnp.array([T, T - 2], jnp.int32)
  mask = (jnp.arange(T)[None, :] < lengths[:, None]).astype(jnp.float32)  # (B,T)
  params = init_params(k_par, E, H)

  encoded = attn_birnn_encoder(embed, lengths, mask, params)
  encoded = jax.block_until_ready(encoded)
  assert encoded.shape == (B, 2 * H)

  ref = reference_jax(embed, mask, params)
  err = jnp.max(jnp.abs(encoded - ref))
  # Tolerance accounts for the EUP approximate reciprocal in the softmax denom.
  assert jnp.allclose(encoded, ref, atol=2e-3, rtol=2e-3), f"max abs err {err}"

  print("KERNEL_OK")
</pallas_src>

<mosaic_0001>
module attributes {stable_mosaic.version = 11 : i64} {
  func.func @_attn_birnn_kernel(%arg0: memref<8x2x16xf32, #tpu.memory_space<vmem>>, %arg1: memref<8x2xf32, #tpu.memory_space<vmem>>, %arg2: memref<16x64xf32, #tpu.memory_space<vmem>>, %arg3: memref<64x64xf32, #tpu.memory_space<vmem>>, %arg4: memref<1x64xf32, #tpu.memory_space<vmem>>, %arg5: memref<1x1x64xf32, #tpu.memory_space<vmem>>, %arg6: memref<2x64xf32, #tpu.memory_space<vmem>>, %arg7: memref<8x2x64xf32, #tpu.memory_space<vmem>>, %arg8: memref<8x2x64xf32, #tpu.memory_space<vmem>>) attributes {dimension_semantics = [], scalar_prefetch = 0 : i64, scratch_operands = 2 : i64, tpu.core_type = #tpu.core_type<tc>} {
    %c0 = arith.constant 0 : index
    %c0_0 = arith.constant 0 : index
    %c0_1 = arith.constant 0 : index
    %0 = vector.load %arg0[%c0, %c0_0, %c0_1] : memref<8x2x16xf32, #tpu.memory_space<vmem>>, vector<8x2x16xf32>
    %1 = vector.shape_cast %0 : vector<8x2x16xf32> to vector<16x16xf32>
    %c0_2 = arith.constant 0 : index
    %c0_3 = arith.constant 0 : index
    %2 = vector.load %arg2[%c0_2, %c0_3] : memref<16x64xf32, #tpu.memory_space<vmem>>, vector<16x64xf32>
    %cst = arith.constant dense<0.000000e+00> : vector<16x64xf32>
    %3 = tpu.matmul %1, %2, %cst {dimension_numbers = #tpu.dot_dimension_numbers<[1], [0], [0], [1], [0, 0, 1, 1], [], []>} : vector<16x16xf32>, vector<16x64xf32>, vector<16x64xf32> -> vector<16x64xf32>
    %c0_4 = arith.constant 0 : index
    %c0_5 = arith.constant 0 : index
    %4 = vector.load %arg4[%c0_4, %c0_5] : memref<1x64xf32, #tpu.memory_space<vmem>>, vector<1x64xf32>
    %5 = vector.broadcast %4 : vector<1x64xf32> to vector<16x64xf32>
    %6 = arith.addf %3, %5 : vector<16x64xf32>
    %7 = vector.shape_cast %6 : vector<16x64xf32> to vector<8x2x64xf32>
    %c0_6 = arith.constant 0 : index
    %c0_7 = arith.constant 0 : index
    %c0_8 = arith.constant 0 : index
    %8 = vector.load %arg7[%c0_6, %c0_7, %c0_8] : memref<8x2x64xf32, #tpu.memory_space<vmem>>, vector<8x2x64xf32>
    tpu.vector_store %arg7[%c0_6, %c0_7, %c0_8], %7 {strides = array<i32>} : memref<8x2x64xf32, #tpu.memory_space<vmem>>, vector<8x2x64xf32>,
    %c0_9 = arith.constant 0 : index
    %c0_10 = arith.constant 0 : index
    %9 = vector.load %arg3[%c0_9, %c0_10] : memref<64x64xf32, #tpu.memory_space<vmem>>, vector<64x64xf32>
    %10 = tpu.iota {dimensions = array<i32: 1>} : vector<2x64xi32>
    %c32_i32 = arith.constant 32 : i32
    %11 = vector.broadcast %c32_i32 : i32 to vector<2x64xi32>
    %12 = arith.cmpi slt, %10, %11 : vector<2x64xi32>
    %cst_11 = arith.constant 0.000000e+00 : f32
    %13 = vector.broadcast %cst_11 : f32 to vector<2x64xf32>
    %c0_12 = arith.constant 0 : index
    %c0_13 = arith.constant 0 : index
    %c0_14 = arith.constant 0 : index
    %14 = vector.load %arg7[%c0_12, %c0_13, %c0_14] : memref<8x2x64xf32, #tpu.memory_space<vmem>>, vector<1x2x64xf32>
    %15 = vector.shape_cast %14 : vector<1x2x64xf32> to vector<2x64xf32>
    %c7 = arith.constant 7 : index
    %c0_15 = arith.constant 0 : index
    %c0_16 = arith.constant 0 : index
    %16 = vector.load %arg7[%c7, %c0_15, %c0_16] : memref<8x2x64xf32, #tpu.memory_space<vmem>>, vector<1x2x64xf32>
    %17 = vector.shape_cast %16 : vector<1x2x64xf32> to vector<2x64xf32>
    %18 = arith.select %12, %15, %17 : vector<2x64xi1>, vector<2x64xf32>
    %cst_17 = arith.constant dense<0.000000e+00> : vector<2x64xf32>
    %19 = tpu.matmul %13, %9, %cst_17 {dimension_numbers = #tpu.dot_dimension_numbers<[1], [0], [0], [1], [0, 0, 1, 1], [], []>} : vector<2x64xf32>, vector<64x64xf32>, vector<2x64xf32> -> vector<2x64xf32>
    %20 = arith.addf %18, %19 : vector<2x64xf32>
    %21 = math.tanh %20 : vector<2x64xf32>
    %22 = vector.extract_strided_slice %21 {offsets = [0, 0], sizes = [2, 32], strides = [1, 1]} : vector<2x64xf32> to vector<2x32xf32>
    %c0_18 = arith.constant 0 : index
    %c0_19 = arith.constant 0 : index
    %c0_20 = arith.constant 0 : index
    %23 = vector.load %arg8[%c0_18, %c0_19, %c0_20] : memref<8x2x64xf32, #tpu.memory_space<vmem>>, vector<1x2x32xf32>
    %24 = vector.shape_cast %23 : vector<1x2x32xf32> to vector<2x32xf32>
    %25 = vector.shape_cast %22 : vector<2x32xf32> to vector<1x2x32xf32>
    tpu.vector_store %arg8[%c0_18, %c0_19, %c0_20], %25 {strides = array<i32>} : memref<8x2x64xf32, #tpu.memory_space<vmem>>, vector<1x2x32xf32>,
    %26 = vector.extract_strided_slice %21 {offsets = [0, 32], sizes = [2, 32], strides = [1, 1]} : vector<2x64xf32> to vector<2x32xf32>
    %c7_21 = arith.constant 7 : index
    %c0_22 = arith.constant 0 : index
    %c32 = arith.constant 32 : index
    %27 = vector.load %arg8[%c7_21, %c0_22, %c32] : memref<8x2x64xf32, #tpu.memory_space<vmem>>, vector<1x2x32xf32>
    %28 = vector.shape_cast %27 : vector<1x2x32xf32> to vector<2x32xf32>
    %29 = vector.shape_cast %26 : vector<2x32xf32> to vector<1x2x32xf32>
    tpu.vector_store %arg8[%c7_21, %c0_22, %c32], %29 {strides = array<i32>} : memref<8x2x64xf32, #tpu.memory_space<vmem>>, vector<1x2x32xf32>,
    %c1 = arith.constant 1 : index
    %c0_23 = arith.constant 0 : index
    %c0_24 = arith.constant 0 : index
    %30 = vector.load %arg7[%c1, %c0_23, %c0_24] : memref<8x2x64xf32, #tpu.memory_space<vmem>>, vector<1x2x64xf32>
    %31 = vector.shape_cast %30 : vector<1x2x64xf32> to vector<2x64xf32>
    %c6 = arith.constant 6 : index
    %c0_25 = arith.constant 0 : index
    %c0_26 = arith.constant 0 : index
    %32 = vector.load %arg7[%c6, %c0_25, %c0_26] : memref<8x2x64xf32, #tpu.memory_space<vmem>>, vector<1x2x64xf32>
    %33 = vector.shape_cast %32 : vector<1x2x64xf32> to vector<2x64xf32>
    %34 = arith.select %12, %31, %33 : vector<2x64xi1>, vector<2x64xf32>
    %cst_27 = arith.constant dense<0.000000e+00> : vector<2x64xf32>
    %35 = tpu.matmul %21, %9, %cst_27 {dimension_numbers = #tpu.dot_dimension_numbers<[1], [0], [0], [1], [0, 0, 1, 1], [], []>} : vector<2x64xf32>, vector<64x64xf32>, vector<2x64xf32> -> vector<2x64xf32>
    %36 = arith.addf %34, %35 : vector<2x64xf32>
    %37 = math.tanh %36 : vector<2x64xf32>
    %38 = vector.extract_strided_slice %37 {offsets = [0, 0], sizes = [2, 32], strides = [1, 1]} : vector<2x64xf32> to vector<2x32xf32>
    %c1_28 = arith.constant 1 : index
    %c0_29 = arith.constant 0 : index
    %c0_30 = arith.constant 0 : index
    %39 = vector.load %arg8[%c1_28, %c0_29, %c0_30] : memref<8x2x64xf32, #tpu.memory_space<vmem>>, vector<1x2x32xf32>
    %40 = vector.shape_cast %39 : vector<1x2x32xf32> to vector<2x32xf32>
    %41 = vector.shape_cast %38 : vector<2x32xf32> to vector<1x2x32xf32>
    tpu.vector_store %arg8[%c1_28, %c0_29, %c0_30], %41 {strides = array<i32>} : memref<8x2x64xf32, #tpu.memory_space<vmem>>, vector<1x2x32xf32>,
    %42 = vector.extract_strided_slice %37 {offsets = [0, 32], sizes = [2, 32], strides = [1, 1]} : vector<2x64xf32> to vector<2x32xf32>
    %c6_31 = arith.constant 6 : index
    %c0_32 = arith.constant 0 : index
    %c32_33 = arith.constant 32 : index
    %43 = vector.load %arg8[%c6_31, %c0_32, %c32_33] : memref<8x2x64xf32, #tpu.memory_space<vmem>>, vector<1x2x32xf32>
    %44 = vector.shape_cast %43 : vector<1x2x32xf32> to vector<2x32xf32>
    %45 = vector.shape_cast %42 : vector<2x32xf32> to vector<1x2x32xf32>
    tpu.vector_store %arg8[%c6_31, %c0_32, %c32_33], %45 {strides = array<i32>} : memref<8x2x64xf32, #tpu.memory_space<vmem>>, vector<1x2x32xf32>,
    %c2 = arith.constant 2 : index
    %c0_34 = arith.constant 0 : index
    %c0_35 = arith.constant 0 : index
    %46 = vector.load %arg7[%c2, %c0_34, %c0_35] : memref<8x2x64xf32, #tpu.memory_space<vmem>>, vector<1x2x64xf32>
    %47 = vector.shape_cast %46 : vector<1x2x64xf32> to vector<2x64xf32>
    %c5 = arith.constant 5 : index
    %c0_36 = arith.constant 0 : index
    %c0_37 = arith.constant 0 : index
    %48 = vector.load %arg7[%c5, %c0_36, %c0_37] : memref<8x2x64xf32, #tpu.memory_space<vmem>>, vector<1x2x64xf32>
    %49 = vector.shape_cast %48 : vector<1x2x64xf32> to vector<2x64xf32>
    %50 = arith.select %12, %47, %49 : vector<2x64xi1>, vector<2x64xf32>
    %cst_38 = arith.constant dense<0.000000e+00> : vector<2x64xf32>
    %51 = tpu.matmul %37, %9, %cst_38 {dimension_numbers = #tpu.dot_dimension_numbers<[1], [0], [0], [1], [0, 0, 1, 1], [], []>} : vector<2x64xf32>, vector<64x64xf32>, vector<2x64xf32> -> vector<2x64xf32>
    %52 = arith.addf %50, %51 : vector<2x64xf32>
    %53 = math.tanh %52 : vector<2x64xf32>
    %54 = vector.extract_strided_slice %53 {offsets = [0, 0], sizes = [2, 32], strides = [1, 1]} : vector<2x64xf32> to vector<2x32xf32>
    %c2_39 = arith.constant 2 : index
    %c0_40 = arith.constant 0 : index
    %c0_41 = arith.constant 0 : index
    %55 = vector.load %arg8[%c2_39, %c0_40, %c0_41] : memref<8x2x64xf32, #tpu.memory_space<vmem>>, vector<1x2x32xf32>
    %56 = vector.shape_cast %55 : vector<1x2x32xf32> to vector<2x32xf32>
    %57 = vector.shape_cast %54 : vector<2x32xf32> to vector<1x2x32xf32>
    tpu.vector_store %arg8[%c2_39, %c0_40, %c0_41], %57 {strides = array<i32>} : memref<8x2x64xf32, #tpu.memory_space<vmem>>, vector<1x2x32xf32>,
    %58 = vector.extract_strided_slice %53 {offsets = [0, 32], sizes = [2, 32], strides = [1, 1]} : vector<2x64xf32> to vector<2x32xf32>
    %c5_42 = arith.constant 5 : index
    %c0_43 = arith.constant 0 : index
    %c32_44 = arith.constant 32 : index
    %59 = vector.load %arg8[%c5_42, %c0_43, %c32_44] : memref<8x2x64xf32, #tpu.memory_space<vmem>>, vector<1x2x32xf32>
    %60 = vector.shape_cast %59 : vector<1x2x32xf32> to vector<2x32xf32>
    %61 = vector.shape_cast %58 : vector<2x32xf32> to vector<1x2x32xf32>
    tpu.vector_store %arg8[%c5_42, %c0_43, %c32_44], %61 {strides = array<i32>} : memref<8x2x64xf32, #tpu.memory_space<vmem>>, vector<1x2x32xf32>,
    %c3 = arith.constant 3 : index
    %c0_45 = arith.constant 0 : index
    %c0_46 = arith.constant 0 : index
    %62 = vector.load %arg7[%c3, %c0_45, %c0_46] : memref<8x2x64xf32, #tpu.memory_space<vmem>>, vector<1x2x64xf32>
    %63 = vector.shape_cast %62 : vector<1x2x64xf32> to vector<2x64xf32>
    %c4 = arith.constant 4 : index
    %c0_47 = arith.constant 0 : index
    %c0_48 = arith.constant 0 : index
    %64 = vector.load %arg7[%c4, %c0_47, %c0_48] : memref<8x2x64xf32, #tpu.memory_space<vmem>>, vector<1x2x64xf32>
    %65 = vector.shape_cast %64 : vector<1x2x64xf32> to vector<2x64xf32>
    %66 = arith.select %12, %63, %65 : vector<2x64xi1>, vector<2x64xf32>
    %cst_49 = arith.constant dense<0.000000e+00> : vector<2x64xf32>
    %67 = tpu.matmul %53, %9, %cst_49 {dimension_numbers = #tpu.dot_dimension_numbers<[1], [0], [0], [1], [0, 0, 1, 1], [], []>} : vector<2x64xf32>, vector<64x64xf32>, vector<2x64xf32> -> vector<2x64xf32>
    %68 = arith.addf %66, %67 : vector<2x64xf32>
    %69 = math.tanh %68 : vector<2x64xf32>
    %70 = vector.extract_strided_slice %69 {offsets = [0, 0], sizes = [2, 32], strides = [1, 1]} : vector<2x64xf32> to vector<2x32xf32>
    %c3_50 = arith.constant 3 : index
    %c0_51 = arith.constant 0 : index
    %c0_52 = arith.constant 0 : index
    %71 = vector.load %arg8[%c3_50, %c0_51, %c0_52] : memref<8x2x64xf32, #tpu.memory_space<vmem>>, vector<1x2x32xf32>
    %72 = vector.shape_cast %71 : vector<1x2x32xf32> to vector<2x32xf32>
    %73 = vector.shape_cast %70 : vector<2x32xf32> to vector<1x2x32xf32>
    tpu.vector_store %arg8[%c3_50, %c0_51, %c0_52], %73 {strides = array<i32>} : memref<8x2x64xf32, #tpu.memory_space<vmem>>, vector<1x2x32xf32>,
    %74 = vector.extract_strided_slice %69 {offsets = [0, 32], sizes = [2, 32], strides = [1, 1]} : vector<2x64xf32> to vector<2x32xf32>
    %c4_53 = arith.constant 4 : index
    %c0_54 = arith.constant 0 : index
    %c32_55 = arith.constant 32 : index
    %75 = vector.load %arg8[%c4_53, %c0_54, %c32_55] : memref<8x2x64xf32, #tpu.memory_space<vmem>>, vector<1x2x32xf32>
    %76 = vector.shape_cast %75 : vector<1x2x32xf32> to vector<2x32xf32>
    %77 = vector.shape_cast %74 : vector<2x32xf32> to vector<1x2x32xf32>
    tpu.vector_store %arg8[%c4_53, %c0_54, %c32_55], %77 {strides = array<i32>} : memref<8x2x64xf32, #tpu.memory_space<vmem>>, vector<1x2x32xf32>,
    %c4_56 = arith.constant 4 : index
    %c0_57 = arith.constant 0 : index
    %c0_58 = arith.constant 0 : index
    %78 = vector.load %arg7[%c4_56, %c0_57, %c0_58] : memref<8x2x64xf32, #tpu.memory_space<vmem>>, vector<1x2x64xf32>
    %79 = vector.shape_cast %78 : vector<1x2x64xf32> to vector<2x64xf32>
    %c3_59 = arith.constant 3 : index
    %c0_60 = arith.constant 0 : index
    %c0_61 = arith.constant 0 : index
    %80 = vector.load %arg7[%c3_59, %c0_60, %c0_61] : memref<8x2x64xf32, #tpu.memory_space<vmem>>, vector<1x2x64xf32>
    %81 = vector.shape_cast %80 : vector<1x2x64xf32> to vector<2x64xf32>
    %82 = arith.select %12, %79, %81 : vector<2x64xi1>, vector<2x64xf32>
    %cst_62 = arith.constant dense<0.000000e+00> : vector<2x64xf32>
    %83 = tpu.matmul %69, %9, %cst_62 {dimension_numbers = #tpu.dot_dimension_numbers<[1], [0], [0], [1], [0, 0, 1, 1], [], []>} : vector<2x64xf32>, vector<64x64xf32>, vector<2x64xf32> -> vector<2x64xf32>
    %84 = arith.addf %82, %83 : vector<2x64xf32>
    %85 = math.tanh %84 : vector<2x64xf32>
    %86 = vector.extract_strided_slice %85 {offsets = [0, 0], sizes = [2, 32], strides = [1, 1]} : vector<2x64xf32> to vector<2x32xf32>
    %c4_63 = arith.constant 4 : index
    %c0_64 = arith.constant 0 : index
    %c0_65 = arith.constant 0 : index
    %87 = vector.load %arg8[%c4_63, %c0_64, %c0_65] : memref<8x2x64xf32, #tpu.memory_space<vmem>>, vector<1x2x32xf32>
    %88 = vector.shape_cast %87 : vector<1x2x32xf32> to vector<2x32xf32>
    %89 = vector.shape_cast %86 : vector<2x32xf32> to vector<1x2x32xf32>
    tpu.vector_store %arg8[%c4_63, %c0_64, %c0_65], %89 {strides = array<i32>} : memref<8x2x64xf32, #tpu.memory_space<vmem>>, vector<1x2x32xf32>,
    %90 = vector.extract_strided_slice %85 {offsets = [0, 32], sizes = [2, 32], strides = [1, 1]} : vector<2x64xf32> to vector<2x32xf32>
    %c3_66 = arith.constant 3 : index
    %c0_67 = arith.constant 0 : index
    %c32_68 = arith.constant 32 : index
    %91 = vector.load %arg8[%c3_66, %c0_67, %c32_68] : memref<8x2x64xf32, #tpu.memory_space<vmem>>, vector<1x2x32xf32>
    %92 = vector.shape_cast %91 : vector<1x2x32xf32> to vector<2x32xf32>
    %93 = vector.shape_cast %90 : vector<2x32xf32> to vector<1x2x32xf32>
    tpu.vector_store %arg8[%c3_66, %c0_67, %c32_68], %93 {strides = array<i32>} : memref<8x2x64xf32, #tpu.memory_space<vmem>>, vector<1x2x32xf32>,
    %c5_69 = arith.constant 5 : index
    %c0_70 = arith.constant 0 : index
    %c0_71 = arith.constant 0 : index
    %94 = vector.load %arg7[%c5_69, %c0_70, %c0_71] : memref<8x2x64xf32, #tpu.memory_space<vmem>>, vector<1x2x64xf32>
    %95 = vector.shape_cast %94 : vector<1x2x64xf32> to vector<2x64xf32>
    %c2_72 = arith.constant 2 : index
    %c0_73 = arith.constant 0 : index
    %c0_74 = arith.constant 0 : index
    %96 = vector.load %arg7[%c2_72, %c0_73, %c0_74] : memref<8x2x64xf32, #tpu.memory_space<vmem>>, vector<1x2x64xf32>
    %97 = vector.shape_cast %96 : vector<1x2x64xf32> to vector<2x64xf32>
    %98 = arith.select %12, %95, %97 : vector<2x64xi1>, vector<2x64xf32>
    %cst_75 = arith.constant dense<0.000000e+00> : vector<2x64xf32>
    %99 = tpu.matmul %85, %9, %cst_75 {dimension_numbers = #tpu.dot_dimension_numbers<[1], [0], [0], [1], [0, 0, 1, 1], [], []>} : vector<2x64xf32>, vector<64x64xf32>, vector<2x64xf32> -> vector<2x64xf32>
    %100 = arith.addf %98, %99 : vector<2x64xf32>
    %101 = math.tanh %100 : vector<2x64xf32>
    %102 = vector.extract_strided_slice %101 {offsets = [0, 0], sizes = [2, 32], strides = [1, 1]} : vector<2x64xf32> to vector<2x32xf32>
    %c5_76 = arith.constant 5 : index
    %c0_77 = arith.constant 0 : index
    %c0_78 = arith.constant 0 : index
    %103 = vector.load %arg8[%c5_76, %c0_77, %c0_78] : memref<8x2x64xf32, #tpu.memory_space<vmem>>, vector<1x2x32xf32>
    %104 = vector.shape_cast %103 : vector<1x2x32xf32> to vector<2x32xf32>
    %105 = vector.shape_cast %102 : vector<2x32xf32> to vector<1x2x32xf32>
    tpu.vector_store %arg8[%c5_76, %c0_77, %c0_78], %105 {strides = array<i32>} : memref<8x2x64xf32, #tpu.memory_space<vmem>>, vector<1x2x32xf32>,
    %106 = vector.extract_strided_slice %101 {offsets = [0, 32], sizes = [2, 32], strides = [1, 1]} : vector<2x64xf32> to vector<2x32xf32>
    %c2_79 = arith.constant 2 : index
    %c0_80 = arith.constant 0 : index
    %c32_81 = arith.constant 32 : index
    %107 = vector.load %arg8[%c2_79, %c0_80, %c32_81] : memref<8x2x64xf32, #tpu.memory_space<vmem>>, vector<1x2x32xf32>
    %108 = vector.shape_cast %107 : vector<1x2x32xf32> to vector<2x32xf32>
    %109 = vector.shape_cast %106 : vector<2x32xf32> to vector<1x2x32xf32>
    tpu.vector_store %arg8[%c2_79, %c0_80, %c32_81], %109 {strides = array<i32>} : memref<8x2x64xf32, #tpu.memory_space<vmem>>, vector<1x2x32xf32>,
    %c6_82 = arith.constant 6 : index
    %c0_83 = arith.constant 0 : index
    %c0_84 = arith.constant 0 : index
    %110 = vector.load %arg7[%c6_82, %c0_83, %c0_84] : memref<8x2x64xf32, #tpu.memory_space<vmem>>, vector<1x2x64xf32>
    %111 = vector.shape_cast %110 : vector<1x2x64xf32> to vector<2x64xf32>
    %c1_85 = arith.constant 1 : index
    %c0_86 = arith.constant 0 : index
    %c0_87 = arith.constant 0 : index
    %112 = vector.load %arg7[%c1_85, %c0_86, %c0_87] : memref<8x2x64xf32, #tpu.memory_space<vmem>>, vector<1x2x64xf32>
    %113 = vector.shape_cast %112 : vector<1x2x64xf32> to vector<2x64xf32>
    %114 = arith.select %12, %111, %113 : vector<2x64xi1>, vector<2x64xf32>
    %cst_88 = arith.constant dense<0.000000e+00> : vector<2x64xf32>
    %115 = tpu.matmul %101, %9, %cst_88 {dimension_numbers = #tpu.dot_dimension_numbers<[1], [0], [0], [1], [0, 0, 1, 1], [], []>} : vector<2x64xf32>, vector<64x64xf32>, vector<2x64xf32> -> vector<2x64xf32>
    %116 = arith.addf %114, %115 : vector<2x64xf32>
    %117 = math.tanh %116 : vector<2x64xf32>
    %118 = vector.extract_strided_slice %117 {offsets = [0, 0], sizes = [2, 32], strides = [1, 1]} : vector<2x64xf32> to vector<2x32xf32>
    %c6_89 = arith.constant 6 : index
    %c0_90 = arith.constant 0 : index
    %c0_91 = arith.constant 0 : index
    %119 = vector.load %arg8[%c6_89, %c0_90, %c0_91] : memref<8x2x64xf32, #tpu.memory_space<vmem>>, vector<1x2x32xf32>
    %120 = vector.shape_cast %119 : vector<1x2x32xf32> to vector<2x32xf32>
    %121 = vector.shape_cast %118 : vector<2x32xf32> to vector<1x2x32xf32>
    tpu.vector_store %arg8[%c6_89, %c0_90, %c0_91], %121 {strides = array<i32>} : memref<8x2x64xf32, #tpu.memory_space<vmem>>, vector<1x2x32xf32>,
    %122 = vector.extract_strided_slice %117 {offsets = [0, 32], sizes = [2, 32], strides = [1, 1]} : vector<2x64xf32> to vector<2x32xf32>
    %c1_92 = arith.constant 1 : index
    %c0_93 = arith.constant 0 : index
    %c32_94 = arith.constant 32 : index
    %123 = vector.load %arg8[%c1_92, %c0_93, %c32_94] : memref<8x2x64xf32, #tpu.memory_space<vmem>>, vector<1x2x32xf32>
    %124 = vector.shape_cast %123 : vector<1x2x32xf32> to vector<2x32xf32>
    %125 = vector.shape_cast %122 : vector<2x32xf32> to vector<1x2x32xf32>
    tpu.vector_store %arg8[%c1_92, %c0_93, %c32_94], %125 {strides = array<i32>} : memref<8x2x64xf32, #tpu.memory_space<vmem>>, vector<1x2x32xf32>,
    %c7_95 = arith.constant 7 : index
    %c0_96 = arith.constant 0 : index
    %c0_97 = arith.constant 0 : index
    %126 = vector.load %arg7[%c7_95, %c0_96, %c0_97] : memref<8x2x64xf32, #tpu.memory_space<vmem>>, vector<1x2x64xf32>
    %127 = vector.shape_cast %126 : vector<1x2x64xf32> to vector<2x64xf32>
    %c0_98 = arith.constant 0 : index
    %c0_99 = arith.constant 0 : index
    %c0_100 = arith.constant 0 : index
    %128 = vector.load %arg7[%c0_98, %c0_99, %c0_100] : memref<8x2x64xf32, #tpu.memory_space<vmem>>, vector<1x2x64xf32>
    %129 = vector.shape_cast %128 : vector<1x2x64xf32> to vector<2x64xf32>
    %130 = arith.select %12, %127, %129 : vector<2x64xi1>, vector<2x64xf32>
    %cst_101 = arith.constant dense<0.000000e+00> : vector<2x64xf32>
    %131 = tpu.matmul %117, %9, %cst_101 {dimension_numbers = #tpu.dot_dimension_numbers<[1], [0], [0], [1], [0, 0, 1, 1], [], []>} : vector<2x64xf32>, vector<64x64xf32>, vector<2x64xf32> -> vector<2x64xf32>
    %132 = arith.addf %130, %131 : vector<2x64xf32>
    %133 = math.tanh %132 : vector<2x64xf32>
    %134 = vector.extract_strided_slice %133 {offsets = [0, 0], sizes = [2, 32], strides = [1, 1]} : vector<2x64xf32> to vector<2x32xf32>
    %c7_102 = arith.constant 7 : index
    %c0_103 = arith.constant 0 : index
    %c0_104 = arith.constant 0 : index
    %135 = vector.load %arg8[%c7_102, %c0_103, %c0_104] : memref<8x2x64xf32, #tpu.memory_space<vmem>>, vector<1x2x32xf32>
    %136 = vector.shape_cast %135 : vector<1x2x32xf32> to vector<2x32xf32>
    %137 = vector.shape_cast %134 : vector<2x32xf32> to vector<1x2x32xf32>
    tpu.vector_store %arg8[%c7_102, %c0_103, %c0_104], %137 {strides = array<i32>} : memref<8x2x64xf32, #tpu.memory_space<vmem>>, vector<1x2x32xf32>,
    %138 = vector.extract_strided_slice %133 {offsets = [0, 32], sizes = [2, 32], strides = [1, 1]} : vector<2x64xf32> to vector<2x32xf32>
    %c0_105 = arith.constant 0 : index
    %c0_106 = arith.constant 0 : index
    %c32_107 = arith.constant 32 : index
    %139 = vector.load %arg8[%c0_105, %c0_106, %c32_107] : memref<8x2x64xf32, #tpu.memory_space<vmem>>, vector<1x2x32xf32>
    %140 = vector.shape_cast %139 : vector<1x2x32xf32> to vector<2x32xf32>
    %141 = vector.shape_cast %138 : vector<2x32xf32> to vector<1x2x32xf32>
    tpu.vector_store %arg8[%c0_105, %c0_106, %c32_107], %141 {strides = array<i32>} : memref<8x2x64xf32, #tpu.memory_space<vmem>>, vector<1x2x32xf32>,
    %c0_108 = arith.constant 0 : index
    %c0_109 = arith.constant 0 : index
    %c0_110 = arith.constant 0 : index
    %142 = vector.load %arg8[%c0_108, %c0_109, %c0_110] : memref<8x2x64xf32, #tpu.memory_space<vmem>>, vector<8x2x64xf32>
    %c0_111 = arith.constant 0 : index
    %c0_112 = arith.constant 0 : index
    %143 = vector.load %arg1[%c0_111, %c0_112] : memref<8x2xf32, #tpu.memory_space<vmem>>, vector<8x2xf32>
    %cst_113 = arith.constant 0.000000e+00 : f32
    %144 = vector.broadcast %cst_113 : f32 to vector<8x2xf32>
    %145 = arith.cmpf ogt, %143, %144 : vector<8x2xf32>
    %c0_114 = arith.constant 0 : index
    %c0_115 = arith.constant 0 : index
    %c0_116 = arith.constant 0 : index
    %146 = vector.load %arg5[%c0_114, %c0_115, %c0_116] : memref<1x1x64xf32, #tpu.memory_space<vmem>>, vector<1x1x64xf32>
    %147 = vector.broadcast %146 : vector<1x1x64xf32> to vector<8x2x64xf32>
    %148 = arith.mulf %142, %147 : vector<8x2x64xf32>
    %cst_117 = arith.constant dense<0.000000e+00> : vector<8x2xf32>
    %149 = vector.multi_reduction <add>, %148, %cst_117 [2] : vector<8x2x64xf32> to vector<8x2xf32>
    %cst_118 = arith.constant -1.000000e+30 : f32
    %150 = vector.broadcast %cst_118 : f32 to vector<8x2xf32>
    %151 = arith.select %145, %149, %150 : vector<8x2xi1>, vector<8x2xf32>
    %cst_119 = arith.constant dense<0xFF800000> : vector<2xf32>
    %152 = vector.multi_reduction <maximumf>, %151, %cst_119 [0] : vector<8x2xf32> to vector<2xf32>
    %153 = vector.shape_cast %152 : vector<2xf32> to vector<1x2xf32>
    %154 = vector.broadcast %153 : vector<1x2xf32> to vector<8x2xf32>
    %155 = arith.subf %151, %154 : vector<8x2xf32>
    %156 = math.exp %155 : vector<8x2xf32>
    %157 = arith.extui %145 : vector<8x2xi1> to vector<8x2xi32>
    %158 = arith.sitofp %157 : vector<8x2xi32> to vector<8x2xf32>
    %159 = arith.mulf %156, %158 : vector<8x2xf32>
    %cst_120 = arith.constant dense<0.000000e+00> : vector<2xf32>
    %160 = vector.multi_reduction <add>, %159, %cst_120 [0] : vector<8x2xf32> to vector<2xf32>
    %161 = vector.shape_cast %160 : vector<2xf32> to vector<1x2xf32>
    %cst_121 = arith.constant 1.000000e-30 : f32
    %162 = vector.broadcast %cst_121 : f32 to vector<1x2xf32>
    %163 = arith.maximumf %161, %162 : vector<1x2xf32>
    %164 = tpu.reciprocal %163 {approx = true} : vector<1x2xf32> -> vector<1x2xf32>
    %165 = vector.broadcast %164 : vector<1x2xf32> to vector<8x2xf32>
    %166 = arith.mulf %159, %165 : vector<8x2xf32>
    %167 = vector.shape_cast %166 : vector<8x2xf32> to vector<8x2x1xf32>
    %168 = vector.broadcast %167 : vector<8x2x1xf32> to vector<8x2x64xf32>
    %169 = arith.mulf %168, %142 : vector<8x2x64xf32>
    %cst_122 = arith.constant dense<0.000000e+00> : vector<2x64xf32>
    %170 = vector.multi_reduction <add>, %169, %cst_122 [0] : vector<8x2x64xf32> to vector<2x64xf32>
    %c0_123 = arith.constant 0 : index
    %c0_124 = arith.constant 0 : index
    %171 = vector.load %arg6[%c0_123, %c0_124] : memref<2x64xf32, #tpu.memory_space<vmem>>, vector<2x64xf32>
    tpu.vector_store %arg6[%c0_123, %c0_124], %170 {strides = array<i32>} : memref<2x64xf32, #tpu.memory_space<vmem>>, vector<2x64xf32>,
    return
  }
}

</mosaic_0001>

<bundles_post_ra>
// kernel: tpu_custom_call.1
= control target key start
LH: loop header
LB: loop body
LE: loop exit
PB: predicated region body
PF: predicated region fallthrough
CT: control target
= control target key end

     0   :  { %11 = vsyncpa [#allocation5], 0  ;;  %s1881_s0 = inlined_call_operand.hbm [shape: f32[8,2,16], index: 0, kind: input, shape index: {}]   ;;  %s1882_s1 = inlined_call_operand.vmem [shape: f32[8,2], index: 1, kind: input, shape index: {}]   ;;  %s1883_s2 = inlined_call_operand.hbm [shape: f32[16,64], index: 2, kind: input, shape index: {}]   ;;  %s1884_s3 = inlined_call_operand.hbm [shape: f32[64,64], index: 3, kind: input, shape index: {}]   ;;  %s1885_s4 = inlined_call_operand.vmem [shape: f32[1,64], index: 4, kind: input, shape index: {}]   ;;  %s1886_s5 = inlined_call_operand.vmem [shape: f32[1,1,64], index: 5, kind: input, shape index: {}]   ;;  %s1887_s6 = inlined_call_operand.hbm [shape: f32[2,64], index: 6, kind: output, shape index: {}]  }
   0x1   :  { %12 = vsyncpa [#allocation8], 0 }
   0x2   :  { %13 = vsyncpa [#allocation6], 0  ;;  %s1514_s21 = smov [#allocation7]  }
   0x3   :  { %s33_s22 = sshll.u32 %s1514_s21, 4  ;;  %s34_s22 = int_to_ptr.vmem [resolvable:$true] %s33_s22 }
   0x4   :  { %s1436_s23 = scalar_lea.vmem %s34_s22, 256  ;;  %p1441_p1 = scmp.lt.s32.totalorder %s34_s22, %s34_s22 }
   0x5   :  { %p1437_p0 = scmp.ne.s32.totalorder %s34_s22, %s1436_s23  ;;  %p1442_p2 = scmp.lt.s32.totalorder %s1436_s23, %s1436_s23 }
   0x7   :  { %p1443_p3 = por %p1442_p2, %p1441_p1 }
   0x9   :  { %p1444_p4 = pnand %p1443_p3, %p1437_p0 }
   0xb   :  { %1447 = shalt.err (!%p1444_p4)
}
   0xc   :  { %s1515_s24 = smov 128   ;;  %s1516_s25 = smov 8  }
   0xd   :  { %39 = dma.hbm_to_vmem [thread:$0]  %s1883_s2, 256, %s34_s22, [#allocation8], %s1515_s24, %s1515_s24, %s1516_s25  }
   0xe   :  { %s1517_s28 = smov [#allocation4]  }
   0xf   :  { %s19_s29 = sshll.u32 %s1517_s28, 4  ;;  %s20_s29 = int_to_ptr.vmem [resolvable:$true] %s19_s29 }
  0x10   :  { %s1456_s30 = scalar_lea.vmem %s20_s29, 256  ;;  %p1461_p6 = scmp.lt.s32.totalorder %s20_s29, %s20_s29 }
  0x11   :  { %p1457_p5 = scmp.ne.s32.totalorder %s20_s29, %s1456_s30  ;;  %p1462_p7 = scmp.lt.s32.totalorder %s1456_s30, %s1456_s30 }
  0x13   :  { %p1463_p8 = por %p1462_p7, %p1461_p6 }
  0x15   :  { %p1464_p9 = pnand %p1463_p8, %p1457_p5 }
  0x17   :  { %1467 = shalt.err (!%p1464_p9)
}
  0x18   :  { %s1518_s7 = smov 32   ;;  %s1519_s8 = smov 2  }
  0x19   :  { %25 = dma.hbm_to_vmem [thread:$0]  %s1881_s0, 256, %s20_s29, [#allocation5], %s1518_s7, %s1518_s7, %s1519_s8  }
  0x1a   :  { %s1520_s11 = smov [#allocation9]  }
  0x1b   :  { %s45_s12 = sshll.u32 %s1520_s11, 4  ;;  %s46_s12 = int_to_ptr.vmem [resolvable:$true] %s45_s12 }
  0x1c   :  { %s1476_s2 = scalar_lea.vmem %s46_s12, 1024  ;;  %p1481_p11 = scmp.lt.s32.totalorder %s46_s12, %s46_s12 }
  0x1d   :  { %p1477_p10 = scmp.ne.s32.totalorder %s46_s12, %s1476_s2  ;;  %p1482_p12 = scmp.lt.s32.totalorder %s1476_s2, %s1476_s2 }
  0x1f   :  { %p1483_p13 = por %p1482_p12, %p1481_p11 }
  0x21   :  { %p1484_p0 = pnand %p1483_p13, %p1477_p10 }
  0x23   :  { %1487 = shalt.err (!%p1484_p0)
}
  0x24   :  { %51 = dma.hbm_to_vmem [thread:$0]  %s1884_s3, 1024, %s46_s12, [#allocation8], %s1515_s24, %s1515_s24, %s1516_s25  }
  0x25   :  { %1508 = dma.done.wait [#allocation5], 256  }
  0x26   :  { %1509 = vsyncadd [#allocation5], 4294967040 }
  0x27   :  { %1510 = dma.done.wait [#allocation8], 1280  }
  0x28   :  { %1511 = vsyncadd [#allocation8], 4294966016  ;;  %v95_v0 = vlaneseq  ;;  %v1521_v1 = vmov 1983009808   ;;  %v1522_v3 = vmov 0.0   ;;  %vm1523_vm0 = vmmov 0  }
  0x29   :  { %v93_v2 = vunpack.c.l.s4 %v1521_v1  ;;  %1245 = vmatprep.subr.mxu1 %v1522_v3  ;;  %1261 = vmatprep.mubr.msk.f32.mxu1 %vm1523_vm0, %v1522_v3  ;;  %v74_v6 = vld [vmem:[#allocation7 + $0x8] sm:$0xff]  ;;  %v73_v7 = vld [vmem:[#allocation7] sm:$0xff]  ;;  %v65_v8 = vld [vmem:[#allocation4] sm:$0x3]  ;;  %vm124_vm1 = vcmask 130048   ;;  %vm248_vm2 = vcmask 517120  }
  0x2a   :  { %v1573_v5 = vshrl.u32 %v95_v0, 7  ;;  %1238 = vmatprep.subr.mxu0 %v74_v6  ;;  %v66_v10 = vld [vmem:[#allocation4 + $0x2] sm:$0x3]  ;;  %v67_v11 = vld [vmem:[#allocation4 + $0x4] sm:$0x3]  ;;  %v1578_v20 = vld [vmem:[#allocation9 + $0x38] sm:$0xff] }
  0x2b   :  { %v94_v4 = vunpack.c.0.s8 %v93_v2  ;;  %v68_v12 = vld [vmem:[#allocation4 + $0x6] sm:$0x3]  ;;  %1239 = vmatpush3.msra.mxu0 %v74_v6  ;;  %v90_v13 = vcombine.low %v65_v8, %v66_v10  ;;  %v69_v15 = vld [vmem:[#allocation4 + $0x8] sm:$0x3]  ;;  %v70_v16 = vld [vmem:[#allocation4 + $0xa] sm:$0x3]  ;;  %1246 = vmatpush3.msra.mxu1 %v1578_v20 }
  0x2c   :  { %v91_v14 = vcombine.low %v67_v11, %v68_v12  ;;  %v71_v17 = vld [vmem:[#allocation4 + $0xc] sm:$0x3]  ;;  %1240 = vmatprep.subr.mxu0 %v73_v7  ;;  %v72_v18 = vld [vmem:[#allocation4 + $0xe] sm:$0x3]  ;;  %v107_v19 = vcombine.low %v69_v15, %v70_v16  ;;  %v1580_v21 = vld [vmem:[#allocation9 + $0x30] sm:$0xff]  ;;  %1247 = vmatprep.subr.mxu1 %v1522_v3  ;;  %v1667_v51 = vand.u32 127, %v95_v0 }
  0x2d   :  { %v1576_v9 = vsub.s32 %v94_v4, %v1573_v5  ;;  %1241 = vmatpush3.msra.mxu0 %v73_v7  ;;  %v108_v24 = vcombine.low %v71_v17, %v72_v18  ;;  %v1587_v26 = vld [vmem:[#allocation9 + $0x28] sm:$0xff]  ;;  %1248 = vmatpush3.msra.mxu1 %v1580_v21  ;;  %v1593_v29 = vld [vmem:[#allocation9 + $0x20] sm:$0xff]  ;;  %v1597_v31 = vld [vmem:[#allocation9 + $0x18] sm:$0xff]  ;;  %vm348_vm4 = vcmask 254976   ;;  %vm351_vm5 = vcmask 517376  }
  0x2e   :  { %1264 = vmatprep.subr.mxu0 %v1522_v3  ;;  %1249 = vmatprep.subr.mxu1 %v1522_v3  ;;  %v1601_v32 = vld [vmem:[#allocation9 + $0x10] sm:$0xff]  ;;  %v1607_v33 = vld [vmem:[#allocation9 + $0x8] sm:$0xff]  ;;  %v1613_v34 = vld [vmem:[#allocation9] sm:$0xff]  ;;  %vm267_vm3 = vcmp.lt.s32.totalorder %v1667_v51, 32  ;;  %vm272_vm6 = vcmask 523264   ;;  %vm1014_vm7 = vcmask 1041409  }
  0x2f   :  { %v98_v22 = vrot.slane %v90_v13, %v1576_v9  ;;  %v105_v23 = vrot.slane %v91_v14, %v1576_v9  ;;  %v115_v25 = vrot.slane %v107_v19, %v1576_v9  ;;  %v122_v28 = vrot.slane %v108_v24, %v1576_v9  ;;  %1250 = vmatpush3.msra.mxu1 %v1587_v26  ;;  %v1150_v35 = vld [vmem:[%s1885_s4] ss:$0 sm:$0xff] }
  0x30   :  { %1251 = vmatprep.subr.mxu1 %v1522_v3  ;;  %vm1016_vm8 = vcmask 1042434   ;;  %vm1018_vm9 = vcmask 1043459   ;;  %vm1020_vm10 = vcmask 1044484   ;;  %vm1022_vm11 = vcmask 1045509  }
  0x31   :  { %v106_v27 = vcombine.low %v98_v22, %v105_v23  ;;  %v123_v30 = vcombine.low %v115_v25, %v122_v28  ;;  %1252 = vmatpush3.msra.mxu1 %v1593_v29  ;;  %vm1024_vm12 = vcmask 1046534   ;;  %vm1026_vm13 = vcmask 1047559  }
  0x32   :  { %1253 = vmatprep.subr.mxu1 %v1522_v3  ;;  %vm1030_vm15 = vcmask 15360  }
  0x33   :  { %1242 = vmatprep.mubr.msk.f32.mxu0 %vm124_vm1, %v106_v27  ;;  %1254 = vmatpush3.msra.mxu1 %v1597_v31  ;;  %v1776_v27 = vld [vmem:[%s1886_s5] ss:$0 sm:$0xff] }
  0x34   :  { %1243 = vmatmul.mubr.msk.f32.vlgmr.msra.gmra.mxu0 %vm124_vm1, %v123_v30  ;;  %1255 = vmatprep.subr.mxu1 %v1522_v3 }
  0x35   :  { %1265 = vmatpush3.msra.mxu0 %v1578_v20  ;;  %1256 = vmatpush3.msra.mxu1 %v1601_v32 }
  0x36   :  { %1266 = vmatprep.subr.mxu0 %v1522_v3  ;;  %1257 = vmatprep.subr.mxu1 %v1522_v3 }
  0x37   :  { %1267 = vmatpush3.msra.mxu0 %v1580_v21  ;;  %1258 = vmatpush3.msra.mxu1 %v1607_v33 }
  0x38   :  { %1268 = vmatprep.subr.mxu0 %v1522_v3  ;;  %1259 = vmatprep.subr.mxu1 %v1522_v3 }
  0x39   :  { %1269 = vmatpush3.msra.mxu0 %v1587_v26  ;;  %1260 = vmatpush3.msra.mxu1 %v1613_v34 }
  0x3a   :  { %1270 = vmatprep.subr.mxu0 %v1522_v3  ;;  %1262 = vmatmul.mubr.f32.vlgmr.msra.gmra.mxu1 %v1522_v3 }
  0x3b   :  { %1271 = vmatpush3.msra.mxu0 %v1593_v29  ;;  %1280 = vmatprep.mubr.msk.f32.mxu0 %vm1523_vm0, %v1522_v3 }
  0x3c   :  { %1272 = vmatprep.subr.mxu0 %v1522_v3  ;;  %1283 = vmatprep.subr.mxu1 %v1522_v3 }
  0x3d   :  { %1273 = vmatpush3.msra.mxu0 %v1597_v31  ;;  %1284 = vmatpush3.msra.mxu1 %v1578_v20 }
  0x3e   :  { %1274 = vmatprep.subr.mxu0 %v1522_v3  ;;  %1285 = vmatprep.subr.mxu1 %v1522_v3 }
  0x3f   :  { %1275 = vmatpush3.msra.mxu0 %v1601_v32  ;;  %1286 = vmatpush3.msra.mxu1 %v1580_v21 }
  0x40   :  { %1276 = vmatprep.subr.mxu0 %v1522_v3  ;;  %1287 = vmatprep.subr.mxu1 %v1522_v3 }
  0x41   :  { %1277 = vmatpush3.msra.mxu0 %v1607_v33  ;;  %1288 = vmatpush3.msra.mxu1 %v1587_v26 }
  0x42   :  { %1278 = vmatprep.subr.mxu0 %v1522_v3  ;;  %1299 = vmatprep.mubr.msk.f32.mxu1 %vm1523_vm0, %v1522_v3 }
  0x43   :  { %1279 = vmatpush3.msra.mxu0 %v1613_v34  ;;  %1289 = vmatprep.subr.mxu1 %v1522_v3 }
  0x44   :  { %1302 = vmatprep.subr.mxu0 %v1522_v3  ;;  %1290 = vmatpush3.msra.mxu1 %v1593_v29 }
  0x45   :  { %1291 = vmatprep.subr.mxu1 %v1522_v3 }
  0x46   :  { %1292 = vmatpush3.msra.mxu1 %v1597_v31 }
  0x47   :  { %1293 = vmatprep.subr.mxu1 %v1522_v3 }
  0x48   :  { %1294 = vmatpush3.msra.mxu1 %v1601_v32 }
  0x49   :  { %1295 = vmatprep.subr.mxu1 %v1522_v3 }
  0x4a   :  { %1296 = vmatpush3.msra.mxu1 %v1607_v33 }
  0x4b   :  { %1297 = vmatprep.subr.mxu1 %v1522_v3 }
  0x4c   :  { %1298 = vmatpush3.msra.mxu1 %v1613_v34 }
  0x4d   :  { %1321 = vmatprep.subr.mxu1 %v1522_v3 }
  0xf4   :  { %v1244_v36 = vpop.f32.mrf.mxu0 }
  0xf5   :  { %v201_v37 = vadd.f32 %v1244_v36, %v1150_v35 }
  0xf6   :  { %v195_v38 = vpop.f32.mrf.mxu0 }
  0xf7   :  { %v223_v39 = vcombine.high %v201_v37, %v201_v37  ;;  %v230_v40 = vrot.slane %v201_v37, %v1576_v9  ;;  %v196_v41 = vadd.f32 %v1150_v35, %v195_v38 }
  0xf9   :  { %v237_v42 = vrot.slane %v223_v39, %v1576_v9  ;;  %v238_v43 = vcombine.high %v230_v40, %v230_v40  ;;  %253 = vst.msk [vmem:[#allocation2 + $0x8] sm:$0x3] %vm248_vm2, %v230_v40  ;;  %v206_v44 = vcombine.high %v196_v41, %v196_v41  ;;  %v213_v45 = vrot.slane %v196_v41, %v1576_v9 }
  0xfa   :  { %v342_v50 = vpop.f32.mrf.mxu1 }
  0xfb   :  { %v239_v46 = vcombine.high %v237_v42, %v237_v42  ;;  %254 = vst.msk [vmem:[#allocation2 + $0xa] sm:$0x3] %vm248_vm2, %v238_v43  ;;  %255 = vst.msk [vmem:[#allocation2 + $0xc] sm:$0x3] %vm248_vm2, %v237_v42  ;;  %v220_v47 = vrot.slane %v206_v44, %v1576_v9  ;;  %v221_v48 = vcombine.high %v213_v45, %v213_v45 }
  0xfc   :  { %249 = vst.msk [vmem:[#allocation2] sm:$0x3] %vm248_vm2, %v213_v45  ;;  %v1263_v52 = vpop.f32.mrf.mxu1 }
  0xfd   :  { %256 = vst.msk [vmem:[#allocation2 + $0xe] sm:$0x3] %vm248_vm2, %v239_v46  ;;  %v222_v49 = vcombine.high %v220_v47, %v220_v47  ;;  %250 = vst.msk [vmem:[#allocation2 + $0x2] sm:$0x3] %vm248_vm2, %v221_v48 }
  0xfe   :  { %251 = vst.msk [vmem:[#allocation2 + $0x4] sm:$0x3] %vm248_vm2, %v220_v47 }
  0xff   :  { %252 = vst.msk [vmem:[#allocation2 + $0x6] sm:$0x3] %vm248_vm2, %v222_v49 }
 0x100   :  { %v524_v11 = vld [vmem:[#allocation2 + $0x8] sm:$0x3] }
 0x101   :  { %v605_v18 = vld [vmem:[#allocation2 + $0x8] sm:$0x3] }
 0x102   :  { %v356_v59 = vld [vmem:[#allocation2 + $0xc] sm:$0x3]  ;;  %v440_v2 = vld [vmem:[#allocation2 + $0xa] sm:$0x3] }
 0x103   :  { %v268_v53 = vld [vmem:[#allocation2] sm:$0x3]  ;;  %v765_v42 = vld [vmem:[#allocation2 + $0xc] sm:$0x3] }
 0x104   :  { %v270_v54 = vld [vmem:[#allocation2 + $0xe] sm:$0x3]  ;;  %v354_v58 = vld [vmem:[#allocation2 + $0x2] sm:$0x3] }
 0x105   :  { %v271_v55 = vsel %vm267_vm3, %v268_v53, %v270_v54  ;;  %v357_v60 = vsel %vm267_vm3, %v354_v58, %v356_v59  ;;  %v438_v1 = vld [vmem:[#allocation2 + $0x4] sm:$0x3]  ;;  %v766_v41 = vld [vmem:[#allocation2 + $0x2] sm:$0x3]  ;;  %v845_v52 = vld [vmem:[#allocation2 + $0xe] sm:$0x3] }
 0x106   :  { %v346_v56 = vadd.f32 %v342_v50, %v271_v55  ;;  %v441_v4 = vsel %vm267_vm3, %v438_v1, %v440_v2  ;;  %v522_v10 = vld [vmem:[#allocation2 + $0x6] sm:$0x3]  ;;  %v767_v43 = vsel %vm267_vm3, %v765_v42, %v766_v41  ;;  %v846_v53 = vld [vmem:[#allocation2] sm:$0x3] }
 0x107   :  { %v525_v12 = vsel %vm267_vm3, %v522_v10, %v524_v11  ;;  %v606_v17 = vld [vmem:[#allocation2 + $0x6] sm:$0x3]  ;;  %v847_v54 = vsel %vm267_vm3, %v845_v52, %v846_v53 }
 0x108   :  { %1408 = vtanh.f32 %v346_v56  ;;  %v607_v19 = vsel %vm267_vm3, %v605_v18, %v606_v17 }
 0x115   :  { %v1409_v57 = vpop.eup %1408 }
 0x116   :  { %349 = vst.msk [vmem:[#allocation3] sm:$0x3] %vm348_vm4, %v1409_v57  ;;  %1281 = vmatmul.mubr.msk.f32.vlgmr.msra.gmra.mxu0 %vm272_vm6, %v1409_v57 }
 0x117   :  { %352 = vst.msk [vmem:[#allocation3 + $0xe] sm:$0x3] %vm351_vm5, %v1409_v57  ;;  %1303 = vmatpush3.msra.mxu0 %v1578_v20  ;;  %1318 = vmatprep.mubr.msk.f32.mxu0 %vm1523_vm0, %v1522_v3 }
 0x118   :  { %1304 = vmatprep.subr.mxu0 %v1522_v3 }
 0x119   :  { %1305 = vmatpush3.msra.mxu0 %v1580_v21 }
 0x11a   :  { %1306 = vmatprep.subr.mxu0 %v1522_v3 }
 0x11b   :  { %1307 = vmatpush3.msra.mxu0 %v1587_v26 }
 0x11c   :  { %1308 = vmatprep.subr.mxu0 %v1522_v3 }
 0x11d   :  { %1309 = vmatpush3.msra.mxu0 %v1593_v29 }
 0x11e   :  { %1310 = vmatprep.subr.mxu0 %v1522_v3 }
 0x11f   :  { %1311 = vmatpush3.msra.mxu0 %v1597_v31 }
 0x120   :  { %1312 = vmatprep.subr.mxu0 %v1522_v3 }
 0x121   :  { %1313 = vmatpush3.msra.mxu0 %v1601_v32 }
 0x122   :  { %1314 = vmatprep.subr.mxu0 %v1522_v3 }
 0x123   :  { %1315 = vmatpush3.msra.mxu0 %v1607_v33 }
 0x124   :  { %1316 = vmatprep.subr.mxu0 %v1522_v3 }
 0x125   :  { %1317 = vmatpush3.msra.mxu0 %v1613_v34 }
 0x126   :  { %1340 = vmatprep.subr.mxu0 %v1522_v3 }
 0x1d6   :  { %v427_v61 = vpop.f32.mrf.mxu0 }
 0x1d7   :  { %v431_v62 = vadd.f32 %v427_v61, %v357_v60 }
 0x1d8   :  { %v1282_v63 = vpop.f32.mrf.mxu0 }
 0x1d9   :  { %1410 = vtanh.f32 %v431_v62 }
 0x1e6   :  { %v1411_v0 = vpop.eup %1410 }
 0x1e7   :  { %434 = vst.msk [vmem:[#allocation3 + $0x2] sm:$0x3] %vm348_vm4, %v1411_v0  ;;  %1300 = vmatmul.mubr.msk.f32.vlgmr.msra.gmra.mxu1 %vm272_vm6, %v1411_v0 }
 0x1e8   :  { %436 = vst.msk [vmem:[#allocation3 + $0xc] sm:$0x3] %vm351_vm5, %v1411_v0  ;;  %1322 = vmatpush3.msra.mxu1 %v1578_v20  ;;  %1337 = vmatprep.mubr.msk.f32.mxu1 %vm1523_vm0, %v1522_v3 }
 0x1e9   :  { %1323 = vmatprep.subr.mxu1 %v1522_v3 }
 0x1ea   :  { %1324 = vmatpush3.msra.mxu1 %v1580_v21 }
 0x1eb   :  { %1325 = vmatprep.subr.mxu1 %v1522_v3 }
 0x1ec   :  { %1326 = vmatpush3.msra.mxu1 %v1587_v26 }
 0x1ed   :  { %1327 = vmatprep.subr.mxu1 %v1522_v3 }
 0x1ee   :  { %1328 = vmatpush3.msra.mxu1 %v1593_v29 }
 0x1ef   :  { %1329 = vmatprep.subr.mxu1 %v1522_v3 }
 0x1f0   :  { %1330 = vmatpush3.msra.mxu1 %v1597_v31 }
 0x1f1   :  { %1331 = vmatprep.subr.mxu1 %v1522_v3 }
 0x1f2   :  { %1332 = vmatpush3.msra.mxu1 %v1601_v32 }
 0x1f3   :  { %1333 = vmatprep.subr.mxu1 %v1522_v3 }
 0x1f4   :  { %1334 = vmatpush3.msra.mxu1 %v1607_v33 }
 0x1f5   :  { %1335 = vmatprep.subr.mxu1 %v1522_v3 }
 0x1f6   :  { %1336 = vmatpush3.msra.mxu1 %v1613_v34 }
 0x1f7   :  { %1359 = vmatprep.subr.mxu1 %v1522_v3 }
 0x2a7   :  { %v511_v6 = vpop.f32.mrf.mxu1 }
 0x2a8   :  { %v515_v7 = vadd.f32 %v511_v6, %v441_v4 }
 0x2a9   :  { %v1301_v8 = vpop.f32.mrf.mxu1 }
 0x2aa   :  { %1412 = vtanh.f32 %v515_v7 }
 0x2b7   :  { %v1413_v9 = vpop.eup %1412 }
 0x2b8   :  { %518 = vst.msk [vmem:[#allocation3 + $0x4] sm:$0x3] %vm348_vm4, %v1413_v9  ;;  %1319 = vmatmul.mubr.msk.f32.vlgmr.msra.gmra.mxu0 %vm272_vm6, %v1413_v9 }
 0x2b9   :  { %520 = vst.msk [vmem:[#allocation3 + $0xa] sm:$0x3] %vm351_vm5, %v1413_v9  ;;  %1341 = vmatpush3.msra.mxu0 %v1578_v20  ;;  %1356 = vmatprep.mubr.msk.f32.mxu0 %vm1523_vm0, %v1522_v3 }
 0x2ba   :  { %1342 = vmatprep.subr.mxu0 %v1522_v3 }
 0x2bb   :  { %1343 = vmatpush3.msra.mxu0 %v1580_v21 }
 0x2bc   :  { %1344 = vmatprep.subr.mxu0 %v1522_v3 }
 0x2bd   :  { %1345 = vmatpush3.msra.mxu0 %v1587_v26 }
 0x2be   :  { %1346 = vmatprep.subr.mxu0 %v1522_v3 }
 0x2bf   :  { %1347 = vmatpush3.msra.mxu0 %v1593_v29 }
 0x2c0   :  { %1348 = vmatprep.subr.mxu0 %v1522_v3 }
 0x2c1   :  { %1349 = vmatpush3.msra.mxu0 %v1597_v31 }
 0x2c2   :  { %1350 = vmatprep.subr.mxu0 %v1522_v3 }
 0x2c3   :  { %1351 = vmatpush3.msra.mxu0 %v1601_v32 }
 0x2c4   :  { %1352 = vmatprep.subr.mxu0 %v1522_v3 }
 0x2c5   :  { %1353 = vmatpush3.msra.mxu0 %v1607_v33 }
 0x2c6   :  { %1354 = vmatprep.subr.mxu0 %v1522_v3 }
 0x2c7   :  { %1355 = vmatpush3.msra.mxu0 %v1613_v34 }
 0x2c8   :  { %1378 = vmatprep.subr.mxu0 %v1522_v3 }
 0x378   :  { %v595_v13 = vpop.f32.mrf.mxu0 }
 0x379   :  { %v599_v14 = vadd.f32 %v595_v13, %v525_v12  ;;  %v984_v12 = vsub.s32 %v1667_v51, %v1573_v5  ;;  %v933_v51 = vld [vmem:[%s1882_s1] sm:$0xff]  ;;  %s1524_s1 = smov [#allocation10]  }
 0x37a   :  { %v1320_v15 = vpop.f32.mrf.mxu0  ;;  %vm934_vm14 = vcmp.gt.f32.partialorder %v933_v51, 0.0  ;;  %s1140_s17 = sshll.u32 %s1524_s1, 4  ;;  %s1141_s17 = int_to_ptr.vmem [resolvable:$true] %s1140_s17 }
 0x37b   :  { %1414 = vtanh.f32 %v599_v14  ;;  %s1488_s18 = scalar_lea.vmem %s1141_s17, 32  ;;  %p1493_p2 = scmp.lt.s32.totalorder %s1141_s17, %s1141_s17 }
 0x37c   :  { %p1489_p1 = scmp.ne.s32.totalorder %s1141_s17, %s1488_s18  ;;  %p1494_p3 = scmp.lt.s32.totalorder %s1488_s18, %s1488_s18 }
 0x37e   :  { %p1495_p4 = por %p1494_p3, %p1493_p2 }
 0x380   :  { %p1496_p5 = pnand %p1495_p4, %p1489_p1 }
 0x388   :  { %v1415_v16 = vpop.eup %1414 }
 0x389   :  { %602 = vst.msk [vmem:[#allocation3 + $0x6] sm:$0x3] %vm348_vm4, %v1415_v16  ;;  %1338 = vmatmul.mubr.msk.f32.vlgmr.msra.gmra.mxu1 %vm272_vm6, %v1415_v16 }
 0x38a   :  { %604 = vst.msk [vmem:[#allocation3 + $0x8] sm:$0x3] %vm351_vm5, %v1415_v16  ;;  %1360 = vmatpush3.msra.mxu1 %v1578_v20  ;;  %1375 = vmatprep.mubr.msk.f32.mxu1 %vm1523_vm0, %v1522_v3 }
 0x38b   :  { %1361 = vmatprep.subr.mxu1 %v1522_v3 }
 0x38c   :  { %1362 = vmatpush3.msra.mxu1 %v1580_v21 }
 0x38d   :  { %1363 = vmatprep.subr.mxu1 %v1522_v3 }
 0x38e   :  { %1364 = vmatpush3.msra.mxu1 %v1587_v26 }
 0x38f   :  { %1365 = vmatprep.subr.mxu1 %v1522_v3 }
 0x390   :  { %1366 = vmatpush3.msra.mxu1 %v1593_v29 }
 0x391   :  { %1367 = vmatprep.subr.mxu1 %v1522_v3 }
 0x392   :  { %1368 = vmatpush3.msra.mxu1 %v1597_v31 }
 0x393   :  { %1369 = vmatprep.subr.mxu1 %v1522_v3 }
 0x394   :  { %1370 = vmatpush3.msra.mxu1 %v1601_v32 }
 0x395   :  { %1371 = vmatprep.subr.mxu1 %v1522_v3 }
 0x396   :  { %1372 = vmatpush3.msra.mxu1 %v1607_v33 }
 0x397   :  { %1373 = vmatprep.subr.mxu1 %v1522_v3 }
 0x398   :  { %1374 = vmatpush3.msra.mxu1 %v1613_v34 }
 0x449   :  { %v677_v22 = vpop.f32.mrf.mxu1 }
 0x44a   :  { %v681_v23 = vadd.f32 %v677_v22, %v607_v19 }
 0x44b   :  { %v1339_v24 = vpop.f32.mrf.mxu1 }
 0x44c   :  { %1416 = vtanh.f32 %v681_v23 }
 0x459   :  { %v1417_v25 = vpop.eup %1416 }
 0x45a   :  { %683 = vst.msk [vmem:[#allocation3 + $0x8] sm:$0x3] %vm348_vm4, %v1417_v25  ;;  %1357 = vmatmul.mubr.msk.f32.vlgmr.msra.gmra.mxu0 %vm272_vm6, %v1417_v25 }
 0x45b   :  { %684 = vst.msk [vmem:[#allocation3 + $0x6] sm:$0x3] %vm351_vm5, %v1417_v25  ;;  %1379 = vmatpush3.msra.mxu0 %v1578_v20  ;;  %1394 = vmatprep.mubr.msk.f32.mxu0 %vm1523_vm0, %v1522_v3 }
 0x45c   :  { %1380 = vmatprep.subr.mxu0 %v1522_v3 }
 0x45d   :  { %1381 = vmatpush3.msra.mxu0 %v1580_v21 }
 0x45e   :  { %1382 = vmatprep.subr.mxu0 %v1522_v3 }
 0x45f   :  { %1383 = vmatpush3.msra.mxu0 %v1587_v26  ;;  %v686_v26 = vld [vmem:[#allocation2 + $0x4] sm:$0x3] }
 0x460   :  { %1384 = vmatprep.subr.mxu0 %v1522_v3 }
 0x461   :  { %1385 = vmatpush3.msra.mxu0 %v1593_v29  ;;  %v685_v29 = vld [vmem:[#allocation2 + $0xa] sm:$0x3]  ;;  %v1827_v61 = vld [vmem:[#allocation3 + $0x8] sm:$0x3] }
 0x462   :  { %v1780_v28 = vld [vmem:[#allocation3 + $0x6] sm:$0x3]  ;;  %1386 = vmatprep.subr.mxu0 %v1522_v3  ;;  %v687_v30 = vsel %vm267_vm3, %v685_v29, %v686_v26  ;;  %v946_v2 = vmul.f32 %v1776_v27, %v1827_v61 }
 0x463   :  { %v945_v20 = vmul.f32 %v1776_v27, %v1780_v28  ;;  %1387 = vmatpush3.msra.mxu0 %v1597_v31 }
 0x464   :  { %1388 = vmatprep.subr.mxu0 %v1522_v3  ;;  %v962_v6 = vsel %vm248_vm2, %v946_v2, 0.0 }
 0x465   :  { %v959_v21 = vsel %vm248_vm2, %v945_v20, 0.0  ;;  %1389 = vmatpush3.msra.mxu0 %v1601_v32 }
 0x466   :  { %960 = vadd.xlane.f32.xlu1 %v959_v21  ;;  %1390 = vmatprep.subr.mxu0 %v1522_v3 }
 0x467   :  { %1391 = vmatpush3.msra.mxu0 %v1607_v33 }
 0x468   :  { %1392 = vmatprep.subr.mxu0 %v1522_v3 }
 0x469   :  { %1393 = vmatpush3.msra.mxu0 %v1613_v34 }
 0x4ef   :  { %v961_v9 = vpop.xlane.xlu1 %960 }
 0x4f0   :  { %v997_v17 = vrot.slane %v961_v9, %v984_v12 }
 0x51a   :  { %v757_v31 = vpop.f32.mrf.mxu0 }
 0x51b   :  { %v761_v35 = vadd.f32 %v757_v31, %v687_v30 }
 0x51c   :  { %v1358_v36 = vpop.f32.mrf.mxu0 }
 0x51d   :  { %1418 = vtanh.f32 %v761_v35 }
 0x52a   :  { %v1419_v37 = vpop.eup %1418 }
 0x52b   :  { %763 = vst.msk [vmem:[#allocation3 + $0xa] sm:$0x3] %vm348_vm4, %v1419_v37  ;;  %1376 = vmatmul.mubr.msk.f32.vlgmr.msra.gmra.mxu1 %vm272_vm6, %v1419_v37 }
 0x52c   :  { %764 = vst.msk [vmem:[#allocation3 + $0x4] sm:$0x3] %vm351_vm5, %v1419_v37 }
 0x532   :  { %v1801_v33 = vld [vmem:[#allocation3 + $0xa] sm:$0x3] }
 0x533   :  { %v1799_v32 = vld [vmem:[#allocation3 + $0x4] sm:$0x3]  ;;  %v947_v39 = vmul.f32 %v1776_v27, %v1801_v33 }
 0x534   :  { %v944_v34 = vmul.f32 %v1776_v27, %v1799_v32 }
 0x535   :  { %v965_v40 = vsel %vm248_vm2, %v947_v39, 0.0 }
 0x536   :  { %v956_v38 = vsel %vm248_vm2, %v944_v34, 0.0 }
 0x537   :  { %957 = vadd.xlane.f32.xlu1 %v956_v38 }
 0x53b   :  { %966 = vadd.xlane.f32.xlu1 %v965_v40 }
 0x5c0   :  { %v958_v11 = vpop.xlane.xlu1 %957 }
 0x5c1   :  { %v993_v16 = vrot.slane %v958_v11, %v984_v12  ;;  %v1098_v11 = vsub.s32 6, %v1573_v5 }
 0x5c4   :  { %v967_v18 = vpop.xlane.xlu1 %966 }
 0x5c5   :  { %v1005_v21 = vrot.slane %v967_v18, %v984_v12 }
 0x5eb   :  { %v837_v44 = vpop.f32.mrf.mxu1 }
 0x5ec   :  { %v841_v45 = vadd.f32 %v837_v44, %v767_v43 }
 0x5ed   :  { %v1377_v46 = vpop.f32.mrf.mxu1 }
 0x5ee   :  { %1420 = vtanh.f32 %v841_v45  ;;  %v1161_v46 = vsel %vm934_vm14, 1.0, %v1522_v3 }
 0x5fb   :  { %v1421_v47 = vpop.eup %1420 }
 0x5fc   :  { %843 = vst.msk [vmem:[#allocation3 + $0xc] sm:$0x3] %vm348_vm4, %v1421_v47  ;;  %1395 = vmatmul.mubr.msk.f32.vlgmr.msra.gmra.mxu0 %vm272_vm6, %v1421_v47 }
 0x5fd   :  { %844 = vst.msk [vmem:[#allocation3 + $0x2] sm:$0x3] %vm351_vm5, %v1421_v47 }
 0x603   :  { %v1837_v4 = vld [vmem:[#allocation3 + $0xc] sm:$0x3] }
 0x604   :  { %v1814_v48 = vld [vmem:[#allocation3 + $0x2] sm:$0x3]  ;;  %v948_v7 = vmul.f32 %v1776_v27, %v1837_v4 }
 0x605   :  { %v943_v49 = vmul.f32 %v1776_v27, %v1814_v48 }
 0x606   :  { %v968_v8 = vsel %vm248_vm2, %v948_v7, 0.0  ;;  %v1084_v7 = vsub.s32 4, %v1573_v5 }
 0x607   :  { %v953_v50 = vsel %vm248_vm2, %v943_v49, 0.0 }
 0x608   :  { %954 = vadd.xlane.f32.xlu0 %v953_v50 }
 0x691   :  { %v955_v10 = vpop.xlane.xlu0 %954 }
 0x692   :  { %v989_v14 = vrot.slane %v955_v10, %v984_v12  ;;  %v1077_v10 = vsub.s32 3, %v1573_v5 }
 0x6bc   :  { %v917_v55 = vpop.f32.mrf.mxu0 }
 0x6bd   :  { %v921_v56 = vadd.f32 %v917_v55, %v847_v54 }
 0x6be   :  { %v1396_v57 = vpop.f32.mrf.mxu0 }
 0x6bf   :  { %1422 = vtanh.f32 %v921_v56 }
 0x6cc   :  { %v1423_v58 = vpop.eup %1422 }
 0x6cd   :  { %923 = vst.msk [vmem:[#allocation3 + $0xe] sm:$0x3] %vm348_vm4, %v1423_v58 }
 0x6ce   :  { %924 = vst.msk [vmem:[#allocation3] sm:$0x3] %vm351_vm5, %v1423_v58 }
 0x6d4   :  { %v1825_v60 = vld [vmem:[#allocation3 + $0xe] sm:$0x3] }
 0x6d5   :  { %v1823_v59 = vld [vmem:[#allocation3] sm:$0x3]  ;;  %v949_v63 = vmul.f32 %v1776_v27, %v1825_v60 }
 0x6d6   :  { %v942_v62 = vmul.f32 %v1776_v27, %v1823_v59 }
 0x6d7   :  { %v971_v1 = vsel %vm248_vm2, %v949_v63, 0.0  ;;  %v1056_v63 = vsub.s32 0, %v1573_v5 }
 0x6d8   :  { %v950_v0 = vsel %vm248_vm2, %v942_v62, 0.0  ;;  %972 = vadd.xlane.f32.xlu1 %v971_v1  ;;  %v1063_v62 = vsub.s32 1, %v1573_v5 }
 0x6d9   :  { %951 = vadd.xlane.f32.xlu0 %v950_v0 }
 0x6dd   :  { %963 = vadd.xlane.f32.xlu0 %v962_v6  ;;  %v1070_v6 = vsub.s32 2, %v1573_v5 }
 0x6e1   :  { %969 = vadd.xlane.f32.xlu0 %v968_v8 }
 0x761   :  { %v973_v27 = vpop.xlane.xlu1 %972 }
 0x762   :  { %v952_v13 = vpop.xlane.xlu0 %951  ;;  %v1013_v30 = vrot.slane %v973_v27, %v984_v12 }
 0x763   :  { %v985_v15 = vrot.slane %v952_v13, %v984_v12 }
 0x765   :  { %v1015_v19 = vsel %vm1014_vm7, %v989_v14, %v985_v15  ;;  %v1091_v14 = vsub.s32 5, %v1573_v5 }
 0x766   :  { %v1017_v22 = vsel %vm1016_vm8, %v993_v16, %v1015_v19  ;;  %v964_v23 = vpop.xlane.xlu0 %963  ;;  %v1105_v16 = vsub.s32 7, %v1573_v5 }
 0x767   :  { %v1001_v24 = vrot.slane %v964_v23, %v984_v12  ;;  %v1019_v25 = vsel %vm1018_vm9, %v997_v17, %v1017_v22 }
 0x769   :  { %v1021_v20 = vsel %vm1020_vm10, %v1001_v24, %v1019_v25 }
 0x76a   :  { %v970_v26 = vpop.xlane.xlu0 %969  ;;  %v1023_v31 = vsel %vm1022_vm11, %v1005_v21, %v1021_v20 }
 0x76b   :  { %v1009_v29 = vrot.slane %v970_v26, %v984_v12 }
 0x76d   :  { %v1025_v35 = vsel %vm1024_vm12, %v1009_v29, %v1023_v31 }
 0x76e   :  { %v1027_v36 = vsel %vm1026_vm13, %v1013_v30, %v1025_v35 }
 0x76f   :  { %v1029_v37 = vsel %vm934_vm14, %v1027_v36, -1e+30 }
 0x770   :  { %v1031_v34 = vsel %vm1030_vm15, %v1029_v37, -inf }
 0x771   :  { %v1032_v38 = vrot.slane %v1031_v34, 4 }
 0x773   :  { %v1033_v39 = vmax.f32 %v1031_v34, %v1032_v38 }
 0x775   :  { %v1034_v40 = vrot.slane %v1033_v39, 2 }
 0x777   :  { %v1035_v41 = vmax.f32 %v1033_v39, %v1034_v40 }
 0x779   :  { %v1036_v42 = vrot.slane %v1035_v41, 1 }
 0x77b   :  { %v1037_v43 = vmax.f32 %v1035_v41, %v1036_v42 }
 0x77d   :  { %v1038_v44 = vsub.f32 %v1029_v37, %v1037_v43 }
 0x77f   :  { %v1039_v45 = vmul.f32 1.442695, %v1038_v44 }
 0x781   :  { %1424 = vpow2.f32 %v1039_v45 }
 0x78e   :  { %v1425_v47 = vpop.eup %1424 }
 0x78f   :  { %v1043_v49 = vmul.f32 %v1425_v47, %v1161_v46 }
 0x791   :  { %v1044_v50 = vsel %vm1030_vm15, %v1043_v49, 0.0 }
 0x792   :  { %v1045_v52 = vrot.slane %v1044_v50, 4 }
 0x794   :  { %v1046_v53 = vadd.f32 %v1045_v52, %v1044_v50 }
 0x796   :  { %v1047_v54 = vrot.slane %v1046_v53, 2 }
 0x798   :  { %v1048_v55 = vadd.f32 %v1047_v54, %v1046_v53 }
 0x79a   :  { %v1049_v56 = vrot.slane %v1048_v55, 1 }
 0x79c   :  { %v1050_v57 = vadd.f32 %v1049_v56, %v1048_v55 }
 0x79e   :  { %v1051_v58 = vmax.f32 %v1050_v57, 1e-30 }
 0x7a0   :  { %1426 = vrcp.f32 %v1051_v58 }
 0x7ad   :  { %v1427_v0 = vpop.eup %1426 }
 0x7ae   :  { %v1053_v1 = vmul.f32 %v1427_v0, %v1043_v49 }
 0x7b0   :  { %v1064_v2 = vrot.slane %v1053_v1, %v1063_v62  ;;  %v1057_v3 = vrot.slane %v1053_v1, %v1056_v63  ;;  %v1071_v8 = vrot.slane %v1053_v1, %v1070_v6  ;;  %v1085_v9 = vrot.slane %v1053_v1, %v1084_v7 }
 0x7b1   :  { %v1078_v12 = vrot.slane %v1053_v1, %v1077_v10  ;;  %v1099_v13 = vrot.slane %v1053_v1, %v1098_v11  ;;  %v1092_v15 = vrot.slane %v1053_v1, %v1091_v14  ;;  %v1106_v17 = vrot.slane %v1053_v1, %v1105_v16 }
 0x7b2   :  { %1066 = vbcast.lane.b32.xlu1 %v1064_v2, 256  ;;  %1059 = vbcast.lane.b32.xlu0 %v1057_v3, 256 }
 0x7b6   :  { %1073 = vbcast.lane.b32.xlu1 %v1071_v8, 256  ;;  %1087 = vbcast.lane.b32.xlu0 %v1085_v9, 256 }
 0x7ba   :  { %1080 = vbcast.lane.b32.xlu1 %v1078_v12, 256  ;;  %1101 = vbcast.lane.b32.xlu0 %v1099_v13, 256 }
 0x7be   :  { %1094 = vbcast.lane.b32.xlu1 %v1092_v15, 256 }
 0x7c2   :  { %1108 = vbcast.lane.b32.xlu1 %v1106_v17, 256 }
 0x824   :  { %v1067_v18 = vpop.permute.xlu1 %1066  ;;  %v1060_v19 = vpop.permute.xlu0 %1059 }
 0x825   :  { %v1111_v22 = vmul.f32 %v1067_v18, %v1814_v48  ;;  %v1110_v23 = vmul.f32 %v1060_v19, %v1823_v59 }
 0x827   :  { %v1119_v27 = vsel %vm248_vm2, %v1111_v22, 0.0  ;;  %v1118_v20 = vsel %vm248_vm2, %v1110_v23, 0.0 }
 0x828   :  { %v1074_v24 = vpop.permute.xlu1 %1073  ;;  %v1088_v25 = vpop.permute.xlu0 %1087  ;;  %v1120_v5 = vadd.f32 %v1119_v27, %v1118_v20 }
 0x829   :  { %v1112_v51 = vmul.f32 %v1074_v24, %v1799_v32  ;;  %v1114_v29 = vmul.f32 %v1088_v25, %v1827_v61 }
 0x82b   :  { %v1121_v21 = vsel %vm248_vm2, %v1112_v51, 0.0  ;;  %v1125_v37 = vsel %vm248_vm2, %v1114_v29, 0.0 }
 0x82c   :  { %v1081_v26 = vpop.permute.xlu1 %1080  ;;  %v1122_v31 = vadd.f32 %v1121_v21, %v1120_v5  ;;  %v1102_v48 = vpop.permute.xlu0 %1101 }
 0x82d   :  { %v1113_v30 = vmul.f32 %v1081_v26, %v1780_v28  ;;  %v1116_v34 = vmul.f32 %v1102_v48, %v1837_v4 }
 0x82f   :  { %v1123_v59 = vsel %vm248_vm2, %v1113_v30, 0.0  ;;  %v1129_v61 = vsel %vm248_vm2, %v1116_v34, 0.0 }
 0x830   :  { %v1124_v35 = vadd.f32 %v1123_v59, %v1122_v31  ;;  %v1095_v36 = vpop.permute.xlu1 %1094 }
 0x831   :  { %v1115_v32 = vmul.f32 %v1095_v36, %v1801_v33 }
 0x832   :  { %v1126_v38 = vadd.f32 %v1125_v37, %v1124_v35 }
 0x833   :  { %v1127_v39 = vsel %vm248_vm2, %v1115_v32, 0.0 }
 0x834   :  { %v1128_v40 = vadd.f32 %v1127_v39, %v1126_v38  ;;  %v1109_v41 = vpop.permute.xlu1 %1108 }
 0x835   :  { %v1117_v28 = vmul.f32 %v1109_v41, %v1825_v60 }
 0x836   :  { %v1130_v42 = vadd.f32 %v1129_v61, %v1128_v40 }
 0x837   :  { %v1131_v43 = vsel %vm248_vm2, %v1117_v28, 0.0 }
 0x838   :  { %v1132_v44 = vadd.f32 %v1131_v43, %v1130_v42 }
 0x83a   :  { %1133 = vst.msk [vmem:[#allocation10] sm:$0x3] %vm248_vm2, %v1132_v44 }
 0x83b   :  { %1499 = shalt.err (!%p1496_p5)
}
 0x83c   :  { %1143 = dma.vmem_to_hbm [thread:$0]  %s1141_s17, 32, %s1887_s6, [#allocation6]  }
 0x83d   :  { %1512 = dma.done.wait [#allocation6], 32  }
 0x83e   :  { %1513 = vsyncadd [#allocation6], 4294967264 }
 0x83f   :  { %1147 = vsyncpa [#allocation5], 1 }
 0x840   :  { %1148 = vsyncpa [#allocation8], 1 }
 0x841   :  { %1149 = vsyncpa [#allocation6], 1 }

</bundles_post_ra>
